<compile_context>
chip_gen: v5e
topology: v5e:2x2
jax: 0.10.0
libtpu: 0.0.40
codegen_flags: <defaults>
</compile_context>

<pallas_src>
import jax
import jax.numpy as jnp
from jax.experimental import pallas as pl
from jax.experimental.pallas import tpu as pltpu


def _identity_kernel(x_ref, o_ref):
    # Pure pass-through: copy the current VMEM tile of the input to the output.
    o_ref[...] = x_ref[...]


_MAX_LANES = 4096                  # lane width cap (multiple of 128)
_MAX_TILE_BYTES = 4 * 1024 * 1024  # ~4 MiB per tile -> <=16 MiB double-buffered in+out
_VMEM_LIMIT_BYTES = 32 * 1024 * 1024


def batch_norm_4d(x, num_features=None):
    """Identity forward of the (stub) BatchNorm4d module.

    The reference forward is `return x`, so semantics are exact identity.
    When the tensor admits a zero-cost lane-dense 2-D view (element count is
    a multiple of 128), the identity is materialized through a large-tile
    Pallas copy kernel with input/output aliasing; otherwise we short-circuit
    and return `x` directly (no pad/slice passes).
    """
    del num_features  # unused by the reference forward

    orig_shape = x.shape
    total = 1
    for s in orig_shape:
        total *= s

    # Short-circuit: an identity needs zero HBM traffic.  Only go through the
    # Pallas kernel when we can do so with an exact (pad-free) lane-dense view.
    if total == 0 or total % 128 != 0:
        return x

    # Pick the widest lane dimension (multiple of 128, <= _MAX_LANES) that
    # exactly divides the element count -> exact reshape, no padding.
    quot = total // 128
    lanes = 128
    for g in range(_MAX_LANES // 128, 0, -1):
        if quot % g == 0:
            lanes = 128 * g
            break
    rows = total // lanes

    # Row tile sized to ~_MAX_TILE_BYTES (multiple of 8 sublanes), or the full
    # row extent if the array is smaller than one tile (full-dim blocks are
    # always legal regardless of the (8, 128) divisibility rule).
    itemsize = jnp.dtype(x.dtype).itemsize
    tile_rows_cap = max(8, (_MAX_TILE_BYTES // (lanes * itemsize)) // 8 * 8)
    tile_rows = rows if rows <= tile_rows_cap else tile_rows_cap

    x2d = jnp.reshape(x, (rows, lanes))  # exact reshape, no padding

    grid = (pl.cdiv(rows, tile_rows),)

    out2d = pl.pallas_call(
        _identity_kernel,
        out_shape=jax.ShapeDtypeStruct((rows, lanes), x.dtype),
        grid_spec=pltpu.PrefetchScalarGridSpec(
            num_scalar_prefetch=0,
            grid=grid,
            in_specs=[pl.BlockSpec((tile_rows, lanes), lambda i: (i, 0))],
            out_specs=pl.BlockSpec((tile_rows, lanes), lambda i: (i, 0)),
        ),
        input_output_aliases={0: 0},  # let XLA reuse/elide the output buffer
        compiler_params=pltpu.CompilerParams(
            dimension_semantics=("parallel",),
            vmem_limit_bytes=_VMEM_LIMIT_BYTES,
        ),
    )(x2d)

    return jnp.reshape(out2d, orig_shape)


if __name__ == "__main__":
    key = jax.random.PRNGKey(0)
    # Small 6-D "4D conv" activation: (N, C, D1, D2, D3, D4), channels-first.
    N, C, D1, D2, D3, D4 = 2, 4, 4, 4, 8, 16
    x = jax.random.normal(key, (N, C, D1, D2, D3, D4), dtype=jnp.float32)

    num_features = C  # matches BatchNorm4d(num_features) in __init__ (unused)
    y = batch_norm_4d(x, num_features)
    y = jax.block_until_ready(y)

    # Verify identity semantics exactly.
    assert y.shape == x.shape
    assert y.dtype == x.dtype
    assert bool(jnp.all(y == x))
    print("KERNEL_OK")
</pallas_src>

<mosaic_0001>
module attributes {stable_mosaic.version = 11 : i64} {
  func.func @_identity_kernel(%arg0: i32, %arg1: memref<4x4096xf32, #tpu.memory_space<vmem>>, %arg2: memref<4x4096xf32, #tpu.memory_space<vmem>>) attributes {dimension_semantics = [#tpu.dimension_semantics<parallel>], iteration_bounds = array<i64: 1>, scalar_prefetch = 0 : i64, scratch_operands = 0 : i64, tpu.core_type = #tpu.core_type<tc>, window_params = [{transform_indices = @transform_0, window_bounds = array<i64: 4, 4096>}, {transform_indices = @transform_1, window_bounds = array<i64: 4, 4096>}]} {
    %c0 = arith.constant 0 : index
    %c0_0 = arith.constant 0 : index
    %0 = vector.load %arg1[%c0, %c0_0] : memref<4x4096xf32, #tpu.memory_space<vmem>>, vector<4x4096xf32>
    %c0_1 = arith.constant 0 : index
    %c0_2 = arith.constant 0 : index
    %1 = vector.load %arg2[%c0_1, %c0_2] : memref<4x4096xf32, #tpu.memory_space<vmem>>, vector<4x4096xf32>
    tpu.vector_store %arg2[%c0_1, %c0_2], %0 {strides = array<i32>} : memref<4x4096xf32, #tpu.memory_space<vmem>>, vector<4x4096xf32>,
    return
  }
  func.func @transform_0(%arg0: i32) -> (i32, i32) {
    %c0_i32 = arith.constant 0 : i32
    %c0_i32_0 = arith.constant 0 : i32
    return %arg0, %c0_i32 : i32, i32
  }
  func.func @transform_1(%arg0: i32) -> (i32, i32) {
    %c0_i32 = arith.constant 0 : i32
    %c0_i32_0 = arith.constant 0 : i32
    return %arg0, %c0_i32 : i32, i32
  }
}

</mosaic_0001>

<bundles_post_ra>
// kernel: tpu_custom_call.1
= control target key start
LH: loop header
LB: loop body
LE: loop exit
PB: predicated region body
PF: predicated region fallthrough
CT: control target
= control target key end

     0   :  { %6 = vsyncpa [#allocation3], 0  ;;  %s144_s0 = inlined_call_operand.hbm [shape: f32[4,4096], index: 0, kind: input, shape index: {}, may-alias: {0,1}]   ;;  %s145_s1 = inlined_call_operand.hbm [shape: f32[4,4096], index: 1, kind: output, shape index: {}, may-alias: {0,1}]  }
   0x1   :  { %7 = vsyncpa [#allocation4], 0  ;;  %s13_s8 = sshll.u32 %s144_s0, 4  ;;  %s126_s9 = smov [#allocation2]   ;;  %s14_s8 = int_to_ptr.hbm [resolvable:$true] %s13_s8 }
   0x2   :  { %s15_s10 = sshll.u32 %s126_s9, 4  ;;  %s16_s10 = int_to_ptr.vmem [resolvable:$true] %s15_s10 }
   0x3   :  { %18 = dma.hbm_to_vmem [thread:$0]  %s14_s8, 2048, %s16_s10, [#allocation3]  }
   0x4   :  { %122 = dma.done.wait [#allocation3], 2048  }
   0x5   :  { %123 = vsyncadd [#allocation3], 4294965248  ;;  %v23_v0 = vld [vmem:[#allocation2] sm:$0xff]  ;;  %v24_v1 = vld [vmem:[#allocation2 + $0x8] sm:$0xff]  ;;  %s127_s0 = smov [#allocation5]   ;;  %s62_s14 = sshll.u32 %s145_s1, 4  ;;  %s63_s14 = int_to_ptr.hbm [resolvable:$true] %s62_s14 }
   0x6   :  { %v25_v2 = vld [vmem:[#allocation2 + $0x10] sm:$0xff]  ;;  %39 = vst [vmem:[#allocation5] sm:$0xff] %v23_v0  ;;  %v26_v3 = vld [vmem:[#allocation2 + $0x18] sm:$0xff]  ;;  %v27_v4 = vld [vmem:[#allocation2 + $0x20] sm:$0xff]  ;;  %s60_s11 = sshll.u32 %s127_s0, 4  ;;  %s61_s11 = int_to_ptr.vmem [resolvable:$true] %s60_s11 }
   0x7   :  { %40 = vst [vmem:[#allocation5 + $0x8] sm:$0xff] %v24_v1  ;;  %v28_v5 = vld [vmem:[#allocation2 + $0x28] sm:$0xff]  ;;  %v29_v6 = vld [vmem:[#allocation2 + $0x30] sm:$0xff]  ;;  %v30_v7 = vld [vmem:[#allocation2 + $0x38] sm:$0xff] }
   0x8   :  { %41 = vst [vmem:[#allocation5 + $0x10] sm:$0xff] %v25_v2  ;;  %v31_v8 = vld [vmem:[#allocation2 + $0x40] sm:$0xff]  ;;  %v32_v9 = vld [vmem:[#allocation2 + $0x48] sm:$0xff]  ;;  %v33_v10 = vld [vmem:[#allocation2 + $0x50] sm:$0xff] }
   0x9   :  { %42 = vst [vmem:[#allocation5 + $0x18] sm:$0xff] %v26_v3  ;;  %v34_v11 = vld [vmem:[#allocation2 + $0x58] sm:$0xff]  ;;  %v35_v12 = vld [vmem:[#allocation2 + $0x60] sm:$0xff]  ;;  %v36_v13 = vld [vmem:[#allocation2 + $0x68] sm:$0xff] }
   0xa   :  { %43 = vst [vmem:[#allocation5 + $0x20] sm:$0xff] %v27_v4  ;;  %v37_v14 = vld [vmem:[#allocation2 + $0x70] sm:$0xff]  ;;  %v38_v15 = vld [vmem:[#allocation2 + $0x78] sm:$0xff] }
   0xb   :  { %44 = vst [vmem:[#allocation5 + $0x28] sm:$0xff] %v28_v5 }
   0xc   :  { %45 = vst [vmem:[#allocation5 + $0x30] sm:$0xff] %v29_v6 }
   0xd   :  { %46 = vst [vmem:[#allocation5 + $0x38] sm:$0xff] %v30_v7 }
   0xe   :  { %47 = vst [vmem:[#allocation5 + $0x40] sm:$0xff] %v31_v8 }
   0xf   :  { %48 = vst [vmem:[#allocation5 + $0x48] sm:$0xff] %v32_v9 }
  0x10   :  { %49 = vst [vmem:[#allocation5 + $0x50] sm:$0xff] %v33_v10 }
  0x11   :  { %50 = vst [vmem:[#allocation5 + $0x58] sm:$0xff] %v34_v11 }
  0x12   :  { %51 = vst [vmem:[#allocation5 + $0x60] sm:$0xff] %v35_v12 }
  0x13   :  { %52 = vst [vmem:[#allocation5 + $0x68] sm:$0xff] %v36_v13 }
  0x14   :  { %53 = vst [vmem:[#allocation5 + $0x70] sm:$0xff] %v37_v14 }
  0x15   :  { %54 = vst [vmem:[#allocation5 + $0x78] sm:$0xff] %v38_v15 }
  0x16   :  { %65 = dma.vmem_to_hbm [thread:$0]  %s61_s11, 2048, %s63_s14, [#allocation4]  }
  0x17   :  { %124 = dma.done.wait [#allocation4], 2048  }
  0x18   :  { %125 = vsyncadd [#allocation4], 4294965248 }
  0x19   :  { %70 = vsyncpa [#allocation3], 1 }
  0x1a   :  { %71 = vsyncpa [#allocation4], 1 }

</bundles_post_ra>
